<compile_context>
chip_gen: v6e
topology: v6e:2x2x1
jax: 0.10.0
libtpu: 0.0.40
codegen_flags: <defaults>
</compile_context>

<pallas_src>
import functools
import math

import numpy as np
import jax
import jax.numpy as jnp
from jax.experimental import pallas as pl
from jax.experimental.pallas import tpu as pltpu


# ----------------------------------------------------------------------------
# helpers
# ----------------------------------------------------------------------------
def _gelu(x):
    # TODO(synk): PyTorch nn.GELU() uses exact erf; tanh approximation used here.
    c = math.sqrt(2.0 / math.pi)
    return 0.5 * x * (1.0 + jnp.tanh(c * (x + 0.044715 * x * x * x)))


def _silu(x):
    return x * jax.nn.sigmoid(x)


def _round_up(x, m):
    return ((x + m - 1) // m) * m


# ----------------------------------------------------------------------------
# Tiled matmul kernel: bf16 operands, f32 accumulator, fused bias/act/residual
# ----------------------------------------------------------------------------
def _mm_kernel(a_ref, b_ref, bias_ref, o_ref, acc_ref, *, activation):
    @pl.when(pl.program_id(2) == 0)
    def _():
        acc_ref[...] = jnp.zeros_like(acc_ref)

    acc_ref[...] += jnp.dot(a_ref[...], b_ref[...],
                            preferred_element_type=jnp.float32)

    @pl.when(pl.program_id(2) == pl.num_programs(2) - 1)
    def _():
        y = acc_ref[...] + bias_ref[...]
        if activation == "gelu":
            y = _gelu(y)
        elif activation == "silu":
            y = _silu(y)
        o_ref[...] = y.astype(o_ref.dtype)


def _mm_res_kernel(a_ref, b_ref, bias_ref, r_ref, o_ref, acc_ref, *, activation):
    @pl.when(pl.program_id(2) == 0)
    def _():
        acc_ref[...] = jnp.zeros_like(acc_ref)

    acc_ref[...] += jnp.dot(a_ref[...], b_ref[...],
                            preferred_element_type=jnp.float32)

    @pl.when(pl.program_id(2) == pl.num_programs(2) - 1)
    def _():
        y = acc_ref[...] + bias_ref[...]
        if activation == "gelu":
            y = _gelu(y)
        elif activation == "silu":
            y = _silu(y)
        o_ref[...] = (y + r_ref[...]).astype(o_ref.dtype)


@functools.partial(jax.jit, static_argnames=("activation", "tm", "tn", "tk"))
def _matmul_padded(a, b, bias, residual, *, activation, tm, tn, tk):
    M, K = a.shape
    _, N = b.shape
    grid = (M // tm, N // tn, K // tk)
    common = dict(
        out_shape=jax.ShapeDtypeStruct((M, N), jnp.float32),
        compiler_params=pltpu.CompilerParams(
            dimension_semantics=("parallel", "parallel", "arbitrary")),
    )
    a_spec = pl.BlockSpec((tm, tk), lambda i, j, k: (i, k))
    b_spec = pl.BlockSpec((tk, tn), lambda i, j, k: (k, j))
    bias_spec = pl.BlockSpec((1, tn), lambda i, j, k: (0, j))
    o_spec = pl.BlockSpec((tm, tn), lambda i, j, k: (i, j))
    if residual is None:
        kern = functools.partial(_mm_kernel, activation=activation)
        gs = pltpu.PrefetchScalarGridSpec(
            num_scalar_prefetch=0, grid=grid,
            in_specs=[a_spec, b_spec, bias_spec], out_specs=o_spec,
            scratch_shapes=[pltpu.VMEM((tm, tn), jnp.float32)])
        return pl.pallas_call(kern, grid_spec=gs, **common)(a, b, bias)
    kern = functools.partial(_mm_res_kernel, activation=activation)
    r_spec = pl.BlockSpec((tm, tn), lambda i, j, k: (i, j))
    gs = pltpu.PrefetchScalarGridSpec(
        num_scalar_prefetch=0, grid=grid,
        in_specs=[a_spec, b_spec, bias_spec, r_spec], out_specs=o_spec,
        scratch_shapes=[pltpu.VMEM((tm, tn), jnp.float32)])
    return pl.pallas_call(kern, grid_spec=gs, **common)(a, b, bias, residual)


def pallas_matmul(a, b, bias=None, activation=None, residual=None):
    """a:(M,K), b:(K,N) [bf16 weights], bias:(N,), residual:(M,N). f32 out."""
    M, K = a.shape
    K2, N = b.shape
    assert K == K2
    Mp = _round_up(M, 8) if M <= 128 else _round_up(M, 128)
    tm = Mp if Mp <= 128 else 128
    Kp = _round_up(K, 128) if K <= 512 else _round_up(K, 512)
    tk = Kp if Kp <= 512 else 512
    Np = _round_up(N, 128) if N <= 256 else _round_up(N, 256)
    tn = Np if Np <= 256 else 256
    a_p = jnp.pad(a.astype(jnp.bfloat16), ((0, Mp - M), (0, Kp - K)))
    b_p = jnp.pad(b.astype(jnp.bfloat16), ((0, Kp - K), (0, Np - N)))
    if bias is None:
        bias_p = jnp.zeros((1, Np), jnp.float32)
    else:
        bias_p = jnp.pad(bias.astype(jnp.float32).reshape(1, N),
                         ((0, 0), (0, Np - N)))
    res_p = None
    if residual is not None:
        res_p = jnp.pad(residual.astype(jnp.float32),
                        ((0, Mp - M), (0, Np - N)))
    out = _matmul_padded(a_p, b_p, bias_p, res_p,
                         activation=activation, tm=tm, tn=tn, tk=tk)
    return out[:M, :N]


# ----------------------------------------------------------------------------
# Fused 3x3 conv + GroupNorm(1,C) (+GELU / +residual / +time-embedding) kernel
#
# Input layout ("tap-concat"): for each sample the spatially-padded image is
# flattened to rows of width Wp = round_up(W+2, 8); row i holds channels of
# the 3 horizontal taps concatenated: xcat[i] = [flat[i], flat[i+1], flat[i+2]].
# The kernel then only needs 3 sublane-ALIGNED slices (offsets dy*Wp) and 3
# bf16 matmuls with (3*Cin, Cout) weights; output rows with (i % Wp) >= W are
# padding and are masked out of the GroupNorm statistics and sliced away later.
# ----------------------------------------------------------------------------
def _conv_gn_kernel(x_ref, w_ref, g_ref, b_ref, e_ref, o_ref, *, H, W, Wp, gelu):
    M = H * Wp
    cout = o_ref.shape[-1]
    acc = jnp.zeros((M, cout), jnp.float32)
    for dy in range(3):
        a = x_ref[0, dy * Wp:dy * Wp + M, :]
        acc = acc + jnp.dot(a, w_ref[dy], preferred_element_type=jnp.float32)
    # GroupNorm(1, cout): one-pass masked statistics over the H*W*cout valid elems
    col = jax.lax.broadcasted_iota(jnp.int32, (M, 1), 0) % Wp
    valid = (col < W).astype(jnp.float32)
    cnt = float(H * W * cout)
    xm = acc * valid
    mean = jnp.sum(xm) / cnt
    var = jnp.maximum(jnp.sum(xm * xm) / cnt - mean * mean, 0.0)
    y = (acc - mean) * jax.lax.rsqrt(var + 1e-5) * g_ref[...] + b_ref[...]
    if gelu:
        y = _gelu(y)
    o_ref[0] = y + e_ref[0]


def _conv_gn_res_kernel(x_ref, r_ref, w_ref, g_ref, b_ref, o_ref, *, H, W, Wp):
    M = H * Wp
    cout = o_ref.shape[-1]
    acc = jnp.zeros((M, cout), jnp.float32)
    for dy in range(3):
        a = x_ref[0, dy * Wp:dy * Wp + M, :]
        acc = acc + jnp.dot(a, w_ref[dy], preferred_element_type=jnp.float32)
    col = jax.lax.broadcasted_iota(jnp.int32, (M, 1), 0) % Wp
    valid = (col < W).astype(jnp.float32)
    cnt = float(H * W * cout)
    xm = acc * valid
    mean = jnp.sum(xm) / cnt
    var = jnp.maximum(jnp.sum(xm * xm) / cnt - mean * mean, 0.0)
    y = (acc - mean) * jax.lax.rsqrt(var + 1e-5) * g_ref[...] + b_ref[...]
    o_ref[0] = _gelu(r_ref[0].astype(jnp.float32) + y)


_CONV_PARAMS = pltpu.CompilerParams(
    dimension_semantics=("parallel",),
    vmem_limit_bytes=32 * 1024 * 1024)


@functools.partial(jax.jit, static_argnames=("H", "W", "gelu"))
def _conv_gn(xcat, w, g, b, e, *, H, W, gelu):
    N, P, C3 = xcat.shape
    cout = w.shape[-1]
    Wp = _round_up(W + 2, 8)
    M = H * Wp
    kern = functools.partial(_conv_gn_kernel, H=H, W=W, Wp=Wp, gelu=gelu)
    return pl.pallas_call(
        kern,
        out_shape=jax.ShapeDtypeStruct((N, M, cout), jnp.float32),
        grid_spec=pltpu.PrefetchScalarGridSpec(
            num_scalar_prefetch=0, grid=(N,),
            in_specs=[pl.BlockSpec((1, P, C3), lambda n: (n, 0, 0)),
                      pl.BlockSpec((3, C3, cout), lambda n: (0, 0, 0)),
                      pl.BlockSpec((1, cout), lambda n: (0, 0)),
                      pl.BlockSpec((1, cout), lambda n: (0, 0)),
                      pl.BlockSpec((1, 1, cout), lambda n: (n, 0, 0))],
            out_specs=pl.BlockSpec((1, M, cout), lambda n: (n, 0, 0))),
        compiler_params=_CONV_PARAMS,
    )(xcat, w, g, b, e)


@functools.partial(jax.jit, static_argnames=("H", "W"))
def _conv_gn_res(xcat, res, w, g, b, *, H, W):
    N, P, C3 = xcat.shape
    cout = w.shape[-1]
    Wp = _round_up(W + 2, 8)
    M = H * Wp
    kern = functools.partial(_conv_gn_res_kernel, H=H, W=W, Wp=Wp)
    return pl.pallas_call(
        kern,
        out_shape=jax.ShapeDtypeStruct((N, M, cout), jnp.float32),
        grid_spec=pltpu.PrefetchScalarGridSpec(
            num_scalar_prefetch=0, grid=(N,),
            in_specs=[pl.BlockSpec((1, P, C3), lambda n: (n, 0, 0)),
                      pl.BlockSpec((1, M, cout), lambda n: (n, 0, 0)),
                      pl.BlockSpec((3, C3, cout), lambda n: (0, 0, 0)),
                      pl.BlockSpec((1, cout), lambda n: (0, 0)),
                      pl.BlockSpec((1, cout), lambda n: (0, 0))],
            out_specs=pl.BlockSpec((1, M, cout), lambda n: (n, 0, 0))),
        compiler_params=_CONV_PARAMS,
    )(xcat, res, w, g, b)


def _conv_input(x):
    """(N,H,W,C) -> (N, (H+2)*Wp, 3*C) bf16 'tap-concat' layout."""
    N, H, W, C = x.shape
    Wp = _round_up(W + 2, 8)
    xp = jnp.pad(x.astype(jnp.bfloat16),
                 ((0, 0), (1, 1), (1, Wp - W - 1), (0, 0)))   # (N, H+2, Wp, C)
    flat = xp.reshape(N, (H + 2) * Wp, C)
    flat = jnp.pad(flat, ((0, 0), (0, 2), (0, 0)))
    return jnp.concatenate([flat[:, :-2], flat[:, 1:-1], flat[:, 2:]], axis=-1)


def _res_slab(x):
    """Residual in the same row layout as the conv output slab."""
    N, H, W, C = x.shape
    Wp = _round_up(W + 2, 8)
    xp = jnp.pad(x, ((0, 0), (0, 0), (0, Wp - W), (0, 0)))
    return xp.reshape(N, H * Wp, C)


def _slab_to_dense(slab, H, W):
    N, M, C = slab.shape
    Wp = M // H
    return slab.reshape(N, H, Wp, C)[:, :, :W, :]


def double_conv(p, x, emb=None, residual=False):
    N, H, W, _ = x.shape
    cmid = p['w1'].shape[-1]
    cout = p['w2'].shape[-1]
    xcat = _conv_input(x)
    h_slab = _conv_gn(xcat, p['w1'], p['g1'], p['b1'],
                      jnp.zeros((N, 1, cmid), jnp.float32),
                      H=H, W=W, gelu=True)
    hcat = _conv_input(_slab_to_dense(h_slab, H, W))
    if residual:
        out_slab = _conv_gn_res(hcat, _res_slab(x), p['w2'], p['g2'], p['b2'],
                                H=H, W=W)
    else:
        if emb is None:
            emb = jnp.zeros((N, 1, cout), jnp.float32)
        else:
            emb = emb.reshape(N, 1, cout)
        out_slab = _conv_gn(hcat, p['w2'], p['g2'], p['b2'], emb,
                            H=H, W=W, gelu=False)
    return _slab_to_dense(out_slab, H, W)


# ----------------------------------------------------------------------------
# LayerNorm (over last dim)
# ----------------------------------------------------------------------------
def _ln_kernel(x_ref, g_ref, b_ref, o_ref):
    x = x_ref[...].astype(jnp.float32)
    mean = jnp.mean(x, axis=-1, keepdims=True)
    var = jnp.mean(jnp.square(x - mean), axis=-1, keepdims=True)
    o_ref[...] = ((x - mean) * jax.lax.rsqrt(var + 1e-5)
                  * g_ref[...] + b_ref[...])


@jax.jit
def _layernorm_2d(x, gamma, beta):
    R, C = x.shape
    tr = min(256, R)
    assert R % tr == 0
    return pl.pallas_call(
        _ln_kernel,
        out_shape=jax.ShapeDtypeStruct((R, C), jnp.float32),
        grid_spec=pltpu.PrefetchScalarGridSpec(
            num_scalar_prefetch=0, grid=(R // tr,),
            in_specs=[pl.BlockSpec((tr, C), lambda i: (i, 0)),
                      pl.BlockSpec((1, C), lambda i: (0, 0)),
                      pl.BlockSpec((1, C), lambda i: (0, 0))],
            out_specs=pl.BlockSpec((tr, C), lambda i: (i, 0))),
        compiler_params=pltpu.CompilerParams(
            dimension_semantics=("parallel",)),
    )(x, gamma, beta)


# ----------------------------------------------------------------------------
# Lane-dense multi-head attention: one batch per grid step, all heads in-kernel
# ----------------------------------------------------------------------------
def _attn_kernel(q_ref, k_ref, v_ref, o_ref, *, nheads, scale):
    C = q_ref.shape[-1]
    dh = C // nheads
    q = q_ref[0].astype(jnp.bfloat16)          # (TQ, C)
    k = k_ref[0].astype(jnp.bfloat16)          # (S, C)
    v = v_ref[0].astype(jnp.bfloat16)          # (S, C)
    outs = []
    for h in range(nheads):
        qh = q[:, h * dh:(h + 1) * dh]
        kh = k[:, h * dh:(h + 1) * dh]
        vh = v[:, h * dh:(h + 1) * dh]
        s = jax.lax.dot_general(qh, kh, (((1,), (1,)), ((), ())),
                                preferred_element_type=jnp.float32) * scale
        m = jnp.max(s, axis=-1, keepdims=True)
        e = jnp.exp(s - m)
        p = e * pl.reciprocal(jnp.sum(e, axis=-1, keepdims=True), approx=True)
        outs.append(jnp.dot(p.astype(jnp.bfloat16), vh,
                            preferred_element_type=jnp.float32))
    o_ref[0] = jnp.concatenate(outs, axis=-1)


@functools.partial(jax.jit, static_argnames=("nheads",))
def _attention(q, k, v, nheads=4):
    N, S, C = q.shape
    dh = C // nheads
    scale = 1.0 / math.sqrt(dh)
    tq = min(S, 128)
    kern = functools.partial(_attn_kernel, nheads=nheads, scale=scale)
    return pl.pallas_call(
        kern,
        out_shape=jax.ShapeDtypeStruct((N, S, C), jnp.float32),
        grid_spec=pltpu.PrefetchScalarGridSpec(
            num_scalar_prefetch=0, grid=(N, S // tq),
            in_specs=[pl.BlockSpec((1, tq, C), lambda n, i: (n, i, 0)),
                      pl.BlockSpec((1, S, C), lambda n, i: (n, 0, 0)),
                      pl.BlockSpec((1, S, C), lambda n, i: (n, 0, 0))],
            out_specs=pl.BlockSpec((1, tq, C), lambda n, i: (n, i, 0))),
        compiler_params=pltpu.CompilerParams(
            dimension_semantics=("parallel", "arbitrary")),
    )(q, k, v)


def self_attention(p, x):
    N, H, W, C = x.shape
    S = H * W
    x_flat = x.reshape(N * S, C)
    x_ln = _layernorm_2d(x_flat, p['ln1_g'], p['ln1_b'])
    qkv = pallas_matmul(x_ln, p['w_qkv'], p['b_qkv']).reshape(N, S, 3 * C)
    q = qkv[:, :, :C]
    k = qkv[:, :, C:2 * C]
    v = qkv[:, :, 2 * C:]
    o = _attention(q, k, v, nheads=4).reshape(N * S, C)
    att = pallas_matmul(o, p['wo'], p['bo'], residual=x_flat)        # + x
    h = _layernorm_2d(att, p['ln2_g'], p['ln2_b'])
    h = pallas_matmul(h, p['ff_w1'], p['ff_b1'], activation='gelu')
    out = pallas_matmul(h, p['ff_w2'], p['ff_b2'], residual=att)     # + att
    return out.reshape(N, H, W, C)


# ----------------------------------------------------------------------------
# Small elementwise kernels
# ----------------------------------------------------------------------------
def _silu_kernel(x_ref, o_ref):
    o_ref[...] = _silu(x_ref[...].astype(jnp.float32))


@jax.jit
def _psilu(x):
    return pl.pallas_call(
        _silu_kernel, out_shape=jax.ShapeDtypeStruct(x.shape, jnp.float32))(x)


def _max4_kernel(a_ref, b_ref, c_ref, d_ref, o_ref):
    o_ref[...] = jnp.maximum(jnp.maximum(a_ref[...], b_ref[...]),
                             jnp.maximum(c_ref[...], d_ref[...]))


@jax.jit
def _pmax4(a, b, c, d):
    return pl.pallas_call(
        _max4_kernel,
        out_shape=jax.ShapeDtypeStruct(a.shape, jnp.float32))(a, b, c, d)


def maxpool2(x):
    # TODO(synk): uses 4 XLA strided slices + one fused Pallas max; a single
    # strided-window kernel would avoid the (small) slice copies.
    N, H, W, C = x.shape
    a = x[:, 0::2, 0::2, :].reshape(-1, C)
    b = x[:, 0::2, 1::2, :].reshape(-1, C)
    c = x[:, 1::2, 0::2, :].reshape(-1, C)
    d = x[:, 1::2, 1::2, :].reshape(-1, C)
    return _pmax4(a, b, c, d).reshape(N, H // 2, W // 2, C)


# ----------------------------------------------------------------------------
# Bilinear 2x upsample (align_corners=True) via two small Pallas matmuls
# ----------------------------------------------------------------------------
def _bilinear_matrix(n_in):
    n_out = 2 * n_in
    A = np.zeros((n_out, n_in), dtype=np.float32)
    if n_in == 1:
        A[:, 0] = 1.0
        return jnp.asarray(A)
    ratio = (n_in - 1) / (n_out - 1)
    for i in range(n_out):
        src = i * ratio
        j0 = int(math.floor(src))
        j1 = min(j0 + 1, n_in - 1)
        f = src - j0
        A[i, j0] += 1.0 - f
        A[i, j1] += f
    return jnp.asarray(A)


def upsample2x(x):
    N, H, W, C = x.shape
    Ah = _bilinear_matrix(H)
    Aw = _bilinear_matrix(W)
    yh = pallas_matmul(Ah, jnp.transpose(x, (1, 0, 2, 3)).reshape(H, N * W * C))
    yh = yh.reshape(2 * H, N, W, C)
    yw = pallas_matmul(Aw, jnp.transpose(yh, (2, 1, 0, 3)).reshape(W, N * 2 * H * C))
    yw = yw.reshape(2 * W, N, 2 * H, C)
    return jnp.transpose(yw, (1, 2, 0, 3))                 # (N, 2H, 2W, C)


# ----------------------------------------------------------------------------
# Blocks
# ----------------------------------------------------------------------------
def down_block(p, x, t_silu):
    x = maxpool2(x)
    x = double_conv(p['dc1'], x, residual=True)
    emb = pallas_matmul(t_silu, p['emb_w'], p['emb_b'])      # (N, cout)
    return double_conv(p['dc2'], x, emb=emb)                 # emb add fused


def up_block(p, x, skip, t_silu):
    x = upsample2x(x)
    x = jnp.concatenate([skip, x], axis=-1)                  # skip first (dim=1)
    x = double_conv(p['dc1'], x, residual=True)
    emb = pallas_matmul(t_silu, p['emb_w'], p['emb_b'])
    return double_conv(p['dc2'], x, emb=emb)


def conv1x1(x, w, b):
    N, H, W, Cin = x.shape
    cout = w.shape[-1]
    out = pallas_matmul(x.reshape(N * H * W, Cin), w, b)
    return out.reshape(N, H, W, cout)


def pos_encoding(t, channels):
    t = t.astype(jnp.float32)[:, None]
    inv_freq = 1.0 / (10000.0 ** (jnp.arange(0, channels, 2, dtype=jnp.float32)
                                  / channels))
    return jnp.concatenate([jnp.sin(t * inv_freq), jnp.cos(t * inv_freq)], axis=-1)


# ----------------------------------------------------------------------------
# Deterministic parameter initialization (shapes per the PyTorch module)
# ----------------------------------------------------------------------------
def _init_conv(key, cin, cout):
    scale = 1.0 / math.sqrt(9 * cin)
    w = jax.random.normal(key, (3, 3, cin, cout), jnp.float32) * scale
    # (dy, dx, cin, cout) -> (dy, dx*cin, cout): matches the tap-concat layout.
    return w.reshape(3, 3 * cin, cout).astype(jnp.bfloat16)


def _init_linear(key, din, dout):
    k1, k2 = jax.random.split(key)
    scale = 1.0 / math.sqrt(din)
    w = (jax.random.normal(k1, (din, dout), jnp.float32) * scale).astype(jnp.bfloat16)
    b = jax.random.normal(k2, (dout,), jnp.float32) * scale
    return w, b


def _init_double_conv(key, cin, cout, cmid=None):
    cmid = cmid if cmid is not None else cout
    k1, k2 = jax.random.split(key)
    return dict(
        w1=_init_conv(k1, cin, cmid),
        g1=jnp.ones((1, cmid), jnp.float32), b1=jnp.zeros((1, cmid), jnp.float32),
        w2=_init_conv(k2, cmid, cout),
        g2=jnp.ones((1, cout), jnp.float32), b2=jnp.zeros((1, cout), jnp.float32))


def _init_down(key, cin, cout, emb_dim=256):
    k1, k2, k3 = jax.random.split(key, 3)
    ew, eb = _init_linear(k3, emb_dim, cout)
    return dict(dc1=_init_double_conv(k1, cin, cin),
                dc2=_init_double_conv(k2, cin, cout),
                emb_w=ew, emb_b=eb)


def _init_up(key, cin, cout, emb_dim=256):
    k1, k2, k3 = jax.random.split(key, 3)
    ew, eb = _init_linear(k3, emb_dim, cout)
    return dict(dc1=_init_double_conv(k1, cin, cin),
                dc2=_init_double_conv(k2, cin, cout, cin // 2),
                emb_w=ew, emb_b=eb)


def _init_sa(key, c):
    ks = jax.random.split(key, 6)
    wq, bq = _init_linear(ks[0], c, c)
    wk, bk = _init_linear(ks[1], c, c)
    wv, bv = _init_linear(ks[2], c, c)
    wo, bo = _init_linear(ks[3], c, c)
    fw1, fb1 = _init_linear(ks[4], c, c)
    fw2, fb2 = _init_linear(ks[5], c, c)
    return dict(
        w_qkv=jnp.concatenate([wq, wk, wv], axis=1),       # fused QKV projection
        b_qkv=jnp.concatenate([bq, bk, bv], axis=0),
        wo=wo, bo=bo,
        ln1_g=jnp.ones((1, c), jnp.float32), ln1_b=jnp.zeros((1, c), jnp.float32),
        ln2_g=jnp.ones((1, c), jnp.float32), ln2_b=jnp.zeros((1, c), jnp.float32),
        ff_w1=fw1, ff_b1=fb1, ff_w2=fw2, ff_b2=fb2)


def init_unet(key, c_in=3, c_out=3):
    ks = jax.random.split(key, 17)
    p = {}
    p['inc'] = _init_double_conv(ks[0], c_in, 64)
    p['down1'] = _init_down(ks[1], 64, 128)
    p['sa1'] = _init_sa(ks[2], 128)
    p['down2'] = _init_down(ks[3], 128, 256)
    p['sa2'] = _init_sa(ks[4], 256)
    p['down3'] = _init_down(ks[5], 256, 256)
    p['sa3'] = _init_sa(ks[6], 256)
    p['bot1'] = _init_double_conv(ks[7], 256, 512)
    p['bot2'] = _init_double_conv(ks[8], 512, 512)
    p['bot3'] = _init_double_conv(ks[9], 512, 256)
    p['up1'] = _init_up(ks[10], 512, 128)
    p['sa4'] = _init_sa(ks[11], 128)
    p['up2'] = _init_up(ks[12], 256, 64)
    p['sa5'] = _init_sa(ks[13], 64)
    p['up3'] = _init_up(ks[14], 128, 64)
    p['sa6'] = _init_sa(ks[15], 64)
    ow, ob = _init_linear(ks[16], 64, c_out)
    p['outc_w'], p['outc_b'] = ow, ob
    return p


# ----------------------------------------------------------------------------
# UNet forward (32x32 images, attention sizes as in the reference)
# ----------------------------------------------------------------------------
@functools.partial(jax.jit, static_argnames=("time_dim",))
def unet_forward(params, x_nchw, t, time_dim=256):
    x = jnp.transpose(x_nchw, (0, 2, 3, 1)).astype(jnp.float32)   # NCHW -> NHWC
    t_emb = pos_encoding(t, time_dim)                             # (N, 256)
    t_silu = _psilu(t_emb)                 # SiLU(t) shared by every emb layer

    x1 = double_conv(params['inc'], x)                            # (N,32,32,64)
    x2 = down_block(params['down1'], x1, t_silu)                  # (N,16,16,128)
    x2 = self_attention(params['sa1'], x2)
    x3 = down_block(params['down2'], x2, t_silu)                  # (N,8,8,256)
    x3 = self_attention(params['sa2'], x3)
    x4 = down_block(params['down3'], x3, t_silu)                  # (N,4,4,256)
    x4 = self_attention(params['sa3'], x4)

    x4 = double_conv(params['bot1'], x4)                          # (N,4,4,512)
    x4 = double_conv(params['bot2'], x4)
    x4 = double_conv(params['bot3'], x4)                          # (N,4,4,256)

    x = up_block(params['up1'], x4, x3, t_silu)                   # (N,8,8,128)
    x = self_attention(params['sa4'], x)
    x = up_block(params['up2'], x, x2, t_silu)                    # (N,16,16,64)
    x = self_attention(params['sa5'], x)
    x = up_block(params['up3'], x, x1, t_silu)                    # (N,32,32,64)
    x = self_attention(params['sa6'], x)

    out = conv1x1(x, params['outc_w'], params['outc_b'])          # (N,32,32,3)
    return jnp.transpose(out, (0, 3, 1, 2))                       # -> NCHW


if __name__ == "__main__":
    key = jax.random.PRNGKey(0)
    kp, kx = jax.random.split(key)
    params = init_unet(kp, c_in=3, c_out=3)

    x = jax.random.normal(kx, (2, 3, 32, 32), jnp.float32)        # NCHW input
    t = jnp.array([10, 500], dtype=jnp.int32)                     # time steps

    out = unet_forward(params, x, t)
    out = jax.block_until_ready(out)
    assert out.shape == (2, 3, 32, 32)
    assert bool(jnp.all(jnp.isfinite(out)))
    print("KERNEL_OK")
</pallas_src>

<mosaic_0001>
module attributes {stable_mosaic.version = 11 : i64} {
  func.func @_silu_kernel(%arg0: memref<2x256xf32, #tpu.memory_space<vmem>>, %arg1: memref<2x256xf32, #tpu.memory_space<vmem>>) attributes {dimension_semantics = [], scalar_prefetch = 0 : i64, scratch_operands = 0 : i64, tpu.core_type = #tpu.core_type<tc>} {
    %c0 = arith.constant 0 : index
    %c0_0 = arith.constant 0 : index
    %0 = vector.load %arg0[%c0, %c0_0] : memref<2x256xf32, #tpu.memory_space<vmem>>, vector<2x256xf32>
    %1 = arith.negf %0 : vector<2x256xf32>
    %2 = math.exp %1 : vector<2x256xf32>
    %cst = arith.constant 1.000000e+00 : f32
    %3 = vector.broadcast %cst : f32 to vector<2x256xf32>
    %4 = arith.addf %3, %2 : vector<2x256xf32>
    %5 = arith.divf %3, %4 : vector<2x256xf32>
    %6 = arith.mulf %0, %5 : vector<2x256xf32>
    %c0_1 = arith.constant 0 : index
    %c0_2 = arith.constant 0 : index
    %7 = vector.load %arg1[%c0_1, %c0_2] : memref<2x256xf32, #tpu.memory_space<vmem>>, vector<2x256xf32>
    tpu.vector_store %arg1[%c0_1, %c0_2], %6 {strides = array<i32>} : memref<2x256xf32, #tpu.memory_space<vmem>>, vector<2x256xf32>,
    return
  }
}

</mosaic_0001>

<bundles_post_ra>
// kernel: _psilu.1
= control target key start
LH: loop header
LB: loop body
LE: loop exit
PB: predicated region body
PF: predicated region fallthrough
CT: control target
= control target key end

     0   :  { %6 = vsyncpa [#allocation3], 0  ;;  %s114_s0 = inlined_call_operand.hbm [shape: f32[2,256], index: 0, kind: input, shape index: {}]   ;;  %s115_s1 = inlined_call_operand.hbm [shape: f32[2,256], index: 1, kind: output, shape index: {}]  }
   0x1   :  { %7 = vsyncpa [#allocation4], 0  ;;  %s96_s6 = smov [#allocation2]  }
   0x2   :  { %s14_s7 = sshll.u32 %s96_s6, 4  ;;  %s15_s7 = int_to_ptr.vmem [resolvable:$true] %s14_s7 }
   0x3   :  { %s60_s8 = scalar_lea.vmem %s15_s7, 64  ;;  %p65_p1 = scmp.lt.s32.totalorder %s15_s7, %s15_s7 }
   0x4   :  { %p61_p0 = scmp.ne.s32.totalorder %s15_s7, %s60_s8  ;;  %p66_p2 = scmp.lt.s32.totalorder %s60_s8, %s60_s8 }
   0x6   :  { %p67_p3 = por %p66_p2, %p65_p1 }
   0x8   :  { %p68_p4 = pnand %p67_p3, %p61_p0 }
   0xa   :  { %71 = shalt.err (!%p68_p4)
}
   0xb   :  { %17 = dma.hbm_to_vmem [thread:$0]  %s114_s0, 64, %s15_s7, [#allocation3]  }
   0xc   :  { %92 = dma.done.wait [#allocation3], 64  }
   0xd   :  { %93 = vsyncadd [#allocation3], 4294967232  ;;  %v21_v0 = vld [vmem:[#allocation2] sm:$0xf]  ;;  %s97_s11 = smov [#allocation5]  }
   0xe   :  { %v45_v1 = vmul.f32 -1.442695, %v21_v0  ;;  %s36_s12 = sshll.u32 %s97_s11, 4  ;;  %s37_s12 = int_to_ptr.vmem [resolvable:$true] %s36_s12 }
   0xf   :  { %s72_s13 = scalar_lea.vmem %s37_s12, 64  ;;  %p77_p6 = scmp.lt.s32.totalorder %s37_s12, %s37_s12 }
  0x10   :  { %48 = vpow2.f32 %v45_v1  ;;  %p73_p5 = scmp.ne.s32.totalorder %s37_s12, %s72_s13  ;;  %p78_p7 = scmp.lt.s32.totalorder %s72_s13, %s72_s13 }
  0x12   :  { %p79_p8 = por %p78_p7, %p77_p6 }
  0x14   :  { %p80_p9 = pnand %p79_p8, %p73_p5 }
  0x1d   :  { %v49_v2 = vpop.eup %48 }
  0x1e   :  { %v25_v3 = vadd.f32 1.0, %v49_v2 }
  0x20   :  { %50 = vrcp.f32 %v25_v3 }
  0x2d   :  { %v51_v4 = vpop.eup %50 }
  0x2e   :  { %v28_v5 = vmul.f32 %v51_v4, %v21_v0 }
  0x30   :  { %29 = vst [vmem:[#allocation5] sm:$0xf] %v28_v5 }
  0x31   :  { %83 = shalt.err (!%p80_p9)
}
  0x32   :  { %39 = dma.vmem_to_hbm [thread:$0]  %s37_s12, 64, %s115_s1, [#allocation4]  }
  0x33   :  { %94 = dma.done.wait [#allocation4], 64  }
  0x34   :  { %95 = vsyncadd [#allocation4], 4294967232 }
  0x35   :  { %43 = vsyncpa [#allocation3], 1 }
  0x36   :  { %44 = vsyncpa [#allocation4], 1 }

</bundles_post_ra>
